<compile_context>
chip_gen: v5e
topology: v5e:2x2
jax: 0.10.0
libtpu: 0.0.40
codegen_flags: <defaults>
</compile_context>

<pallas_src>
import functools

import jax
import jax.numpy as jnp
import numpy as np
from jax import lax
from jax.experimental import pallas as pl
from jax.experimental.pallas import tpu as pltpu


def _im2col_3x3(x_c_hw, yy, xx, H, W):
    """Build the (9*C, H*W) im2col patch matrix for a 3x3 'same' conv.

    x_c_hw: (C, H*W) f32, channels on sublanes, flattened spatial on lanes.
    yy, xx: (1, H*W) int32 row / column index of each flattened position.
    Tap order is (ky, kx) row-major, matching the weight reshape in the wrapper.
    """
    HW = H * W
    taps = []
    for ky in range(3):
        for kx in range(3):
            dy, dx = ky - 1, kx - 1
            off = dy * W + dx
            if off == 0:
                taps.append(x_c_hw)
                continue
            # shifted[p] = x[p + off]  (roll convention: out[i] = in[i - shift])
            rolled = pltpu.roll(x_c_hw, (-off) % HW, axis=1)
            valid = ((yy >= -dy) & (yy < H - dy)
                     & (xx >= -dx) & (xx < W - dx))
            taps.append(jnp.where(valid, rolled, 0.0))
    return jnp.concatenate(taps, axis=0)


def preact_kernel(x_ref, yy_ref, xx_ref, w1_ref, b1_ref, w2_ref, b2_ref,
                  ws_ref, bs_ref, o_ref, *, H, W):
    x = x_ref[0].astype(jnp.float32)                # (CinP, HW)
    yy = yy_ref[...]                                # (1, HW) int32
    xx = xx_ref[...]                                # (1, HW) int32
    w1 = w1_ref[...].astype(jnp.float32)            # (Cout, 9*CinP)
    b1 = b1_ref[...].astype(jnp.float32)            # (Cout, 1)
    w2 = w2_ref[...].astype(jnp.float32)            # (Cout, 9*Cout)
    b2 = b2_ref[...].astype(jnp.float32)            # (Cout, 1)
    ws = ws_ref[...].astype(jnp.float32)            # (Cout, CinP)
    bs = bs_ref[...].astype(jnp.float32)            # (Cout, 1)

    # y = W2(A2(W1(A1(x))))
    a1 = jnp.maximum(x, 0.0)                                        # A1 = ReLU
    p1 = _im2col_3x3(a1, yy, xx, H, W)                              # (9*CinP, HW)
    h1 = jnp.dot(w1, p1, preferred_element_type=jnp.float32) + b1   # W1 3x3 'same'
    a2 = jnp.maximum(h1, 0.0)                                       # A2 = ReLU
    p2 = _im2col_3x3(a2, yy, xx, H, W)                              # (9*Cout, HW)

    acc = jnp.dot(w2, p2, preferred_element_type=jnp.float32)       # W2 3x3 'same'
    acc = acc + jnp.dot(ws, x, preferred_element_type=jnp.float32)  # fused S(x) 1x1
    acc = acc + (b2 + bs)
    o_ref[0] = acc.astype(o_ref.dtype)


def preactivation_pallas(x_nchw, params):
    """Fused PreActivation block. Input/output are NCHW like PyTorch."""
    N, Cin, H, W = x_nchw.shape
    HW = H * W
    w1, b1 = params["w1"], params["b1"]             # (3,3,Cin,Cout), (Cout,)
    w2, b2 = params["w2"], params["b2"]             # (3,3,Cout,Cout), (Cout,)
    ws, bs = params["ws"], params["bs"]             # (Cin,Cout), (Cout,)
    Cout = w1.shape[-1]

    # Pad Cin up to a sublane multiple (8); zero channels contribute nothing.
    CinP = ((Cin + 7) // 8) * 8

    x_flat = jnp.pad(x_nchw.reshape(N, Cin, HW),
                     ((0, 0), (0, CinP - Cin), (0, 0)))

    w1p = jnp.pad(w1, ((0, 0), (0, 0), (0, CinP - Cin), (0, 0)))
    w1_2d = jnp.transpose(w1p, (3, 0, 1, 2)).reshape(Cout, 9 * CinP)
    w2_2d = jnp.transpose(w2, (3, 0, 1, 2)).reshape(Cout, 9 * Cout)
    ws_2d = jnp.transpose(jnp.pad(ws, ((0, CinP - Cin), (0, 0))), (1, 0))
    b1c = b1.reshape(Cout, 1)
    b2c = b2.reshape(Cout, 1)
    bsc = bs.reshape(Cout, 1)

    # Precomputed row / column indices of each flattened spatial position
    # (avoids in-kernel integer div/mod).
    pos = jnp.arange(HW, dtype=jnp.int32)
    yy_in = (pos // W).reshape(1, HW)
    xx_in = (pos % W).reshape(1, HW)

    flops = 2 * N * HW * Cout * (9 * CinP + 9 * Cout + CinP)
    bytes_accessed = 4 * (x_flat.size + yy_in.size + xx_in.size + w1_2d.size
                          + w2_2d.size + ws_2d.size + 3 * Cout + N * Cout * HW)

    kernel = functools.partial(preact_kernel, H=H, W=W)
    out_flat = pl.pallas_call(
        kernel,
        out_shape=jax.ShapeDtypeStruct((N, Cout, HW), x_nchw.dtype),
        grid_spec=pltpu.PrefetchScalarGridSpec(
            num_scalar_prefetch=0,
            grid=(N,),                       # 2 parallel steps -> both v7x TCs busy
            in_specs=[
                pl.BlockSpec((1, CinP, HW), lambda n: (n, 0, 0)),
                pl.BlockSpec((1, HW), lambda n: (0, 0)),
                pl.BlockSpec((1, HW), lambda n: (0, 0)),
                pl.BlockSpec((Cout, 9 * CinP), lambda n: (0, 0)),
                pl.BlockSpec((Cout, 1), lambda n: (0, 0)),
                pl.BlockSpec((Cout, 9 * Cout), lambda n: (0, 0)),
                pl.BlockSpec((Cout, 1), lambda n: (0, 0)),
                pl.BlockSpec((Cout, CinP), lambda n: (0, 0)),
                pl.BlockSpec((Cout, 1), lambda n: (0, 0)),
            ],
            out_specs=pl.BlockSpec((1, Cout, HW), lambda n: (n, 0, 0)),
        ),
        compiler_params=pltpu.CompilerParams(
            dimension_semantics=("parallel",),
        ),
        cost_estimate=pl.CostEstimate(
            flops=flops, transcendentals=0, bytes_accessed=bytes_accessed),
    )(x_flat, yy_in, xx_in, w1_2d, b1c, w2_2d, b2c, ws_2d, bsc)

    return out_flat.reshape(N, Cout, H, W)


def preactivation_reference(x_nchw, params):
    """Pure-JAX reference (lax.conv) with identical semantics."""
    x = jnp.transpose(x_nchw, (0, 2, 3, 1))
    dn = ("NHWC", "HWIO", "NHWC")

    def conv(v, w, b):
        return lax.conv_general_dilated(v, w, (1, 1), "SAME",
                                        dimension_numbers=dn) + b

    a1 = jax.nn.relu(x)
    h1 = conv(a1, params["w1"], params["b1"])
    a2 = jax.nn.relu(h1)
    h2 = conv(a2, params["w2"], params["b2"])
    s = conv(x, params["ws"][None, None], params["bs"])
    return jnp.transpose(s + h2, (0, 3, 1, 2))


def make_params(key, cin, cout):
    k1, k2, k3, k4, k5, k6 = jax.random.split(key, 6)
    return {
        "w1": 0.1 * jax.random.normal(k1, (3, 3, cin, cout), jnp.float32),
        "b1": 0.1 * jax.random.normal(k2, (cout,), jnp.float32),
        "w2": 0.1 * jax.random.normal(k3, (3, 3, cout, cout), jnp.float32),
        "b2": 0.1 * jax.random.normal(k4, (cout,), jnp.float32),
        "ws": 0.1 * jax.random.normal(k5, (cin, cout), jnp.float32),
        "bs": 0.1 * jax.random.normal(k6, (cout,), jnp.float32),
    }


if __name__ == "__main__":
    key = jax.random.PRNGKey(0)
    kx, kp = jax.random.split(key)

    N, Cin, Cout, H, W = 2, 4, 8, 16, 16
    x = jax.random.normal(kx, (N, Cin, H, W), jnp.float32)   # NCHW, like PyTorch
    params = make_params(kp, Cin, Cout)

    out = jax.block_until_ready(preactivation_pallas(x, params))
    ref = jax.block_until_ready(preactivation_reference(x, params))

    np.testing.assert_allclose(np.asarray(out), np.asarray(ref),
                               rtol=1e-4, atol=1e-4)
    print("KERNEL_OK")
</pallas_src>

<mosaic_0001>
module attributes {stable_mosaic.version = 11 : i64} {
  func.func @preact_kernel(%arg0: i32, %arg1: memref<1x8x256xf32, #tpu.memory_space<vmem>>, %arg2: memref<1x256xi32, #tpu.memory_space<vmem>>, %arg3: memref<1x256xi32, #tpu.memory_space<vmem>>, %arg4: memref<8x72xf32, #tpu.memory_space<vmem>>, %arg5: memref<8x1xf32, #tpu.memory_space<vmem>>, %arg6: memref<8x72xf32, #tpu.memory_space<vmem>>, %arg7: memref<8x1xf32, #tpu.memory_space<vmem>>, %arg8: memref<8x8xf32, #tpu.memory_space<vmem>>, %arg9: memref<8x1xf32, #tpu.memory_space<vmem>>, %arg10: memref<1x8x256xf32, #tpu.memory_space<vmem>>) attributes {dimension_semantics = [#tpu.dimension_semantics<parallel>], iteration_bounds = array<i64: 2>, scalar_prefetch = 0 : i64, scratch_operands = 0 : i64, tpu.core_type = #tpu.core_type<tc>, window_params = [{transform_indices = @transform_0, window_bounds = array<i64: 1, 8, 256>}, {pipeline_mode = #tpu.pipeline_mode<synchronous>, transform_indices = @transform_1, window_bounds = array<i64: 1, 256>}, {pipeline_mode = #tpu.pipeline_mode<synchronous>, transform_indices = @transform_2, window_bounds = array<i64: 1, 256>}, {pipeline_mode = #tpu.pipeline_mode<synchronous>, transform_indices = @transform_3, window_bounds = array<i64: 8, 72>}, {pipeline_mode = #tpu.pipeline_mode<synchronous>, transform_indices = @transform_4, window_bounds = array<i64: 8, 1>}, {pipeline_mode = #tpu.pipeline_mode<synchronous>, transform_indices = @transform_5, window_bounds = array<i64: 8, 72>}, {pipeline_mode = #tpu.pipeline_mode<synchronous>, transform_indices = @transform_6, window_bounds = array<i64: 8, 1>}, {pipeline_mode = #tpu.pipeline_mode<synchronous>, transform_indices = @transform_7, window_bounds = array<i64: 8, 8>}, {pipeline_mode = #tpu.pipeline_mode<synchronous>, transform_indices = @transform_8, window_bounds = array<i64: 8, 1>}, {transform_indices = @transform_9, window_bounds = array<i64: 1, 8, 256>}]} {
    %c0 = arith.constant 0 : index
    %c0_0 = arith.constant 0 : index
    %c0_1 = arith.constant 0 : index
    %0 = vector.load %arg1[%c0, %c0_0, %c0_1] : memref<1x8x256xf32, #tpu.memory_space<vmem>>, vector<1x8x256xf32>
    %1 = vector.shape_cast %0 : vector<1x8x256xf32> to vector<8x256xf32>
    %c0_2 = arith.constant 0 : index
    %c0_3 = arith.constant 0 : index
    %2 = vector.load %arg2[%c0_2, %c0_3] : memref<1x256xi32, #tpu.memory_space<vmem>>, vector<1x256xi32>
    %c0_4 = arith.constant 0 : index
    %c0_5 = arith.constant 0 : index
    %3 = vector.load %arg3[%c0_4, %c0_5] : memref<1x256xi32, #tpu.memory_space<vmem>>, vector<1x256xi32>
    %c0_6 = arith.constant 0 : index
    %c0_7 = arith.constant 0 : index
    %4 = vector.load %arg4[%c0_6, %c0_7] : memref<8x72xf32, #tpu.memory_space<vmem>>, vector<8x72xf32>
    %c0_8 = arith.constant 0 : index
    %c0_9 = arith.constant 0 : index
    %5 = vector.load %arg5[%c0_8, %c0_9] : memref<8x1xf32, #tpu.memory_space<vmem>>, vector<8x1xf32>
    %c0_10 = arith.constant 0 : index
    %c0_11 = arith.constant 0 : index
    %6 = vector.load %arg6[%c0_10, %c0_11] : memref<8x72xf32, #tpu.memory_space<vmem>>, vector<8x72xf32>
    %c0_12 = arith.constant 0 : index
    %c0_13 = arith.constant 0 : index
    %7 = vector.load %arg7[%c0_12, %c0_13] : memref<8x1xf32, #tpu.memory_space<vmem>>, vector<8x1xf32>
    %c0_14 = arith.constant 0 : index
    %c0_15 = arith.constant 0 : index
    %8 = vector.load %arg8[%c0_14, %c0_15] : memref<8x8xf32, #tpu.memory_space<vmem>>, vector<8x8xf32>
    %c0_16 = arith.constant 0 : index
    %c0_17 = arith.constant 0 : index
    %9 = vector.load %arg9[%c0_16, %c0_17] : memref<8x1xf32, #tpu.memory_space<vmem>>, vector<8x1xf32>
    %cst = arith.constant 0.000000e+00 : f32
    %10 = vector.broadcast %cst : f32 to vector<8x256xf32>
    %11 = arith.maximumf %1, %10 : vector<8x256xf32>
    %c17_i32 = arith.constant 17 : i32
    %12 = tpu.dynamic_rotate %11 by %c17_i32 dim 1 : vector<8x256xf32>, i32 -> vector<8x256xf32>
    %c1_i32 = arith.constant 1 : i32
    %13 = vector.broadcast %c1_i32 : i32 to vector<1x256xi32>
    %14 = arith.cmpi sge, %2, %13 : vector<1x256xi32>
    %c17_i32_18 = arith.constant 17 : i32
    %15 = vector.broadcast %c17_i32_18 : i32 to vector<1x256xi32>
    %16 = arith.cmpi slt, %2, %15 : vector<1x256xi32>
    %17 = arith.andi %14, %16 : vector<1x256xi1>
    %c1_i32_19 = arith.constant 1 : i32
    %18 = vector.broadcast %c1_i32_19 : i32 to vector<1x256xi32>
    %19 = arith.cmpi sge, %3, %18 : vector<1x256xi32>
    %20 = arith.andi %17, %19 : vector<1x256xi1>
    %c17_i32_20 = arith.constant 17 : i32
    %21 = vector.broadcast %c17_i32_20 : i32 to vector<1x256xi32>
    %22 = arith.cmpi slt, %3, %21 : vector<1x256xi32>
    %23 = arith.andi %20, %22 : vector<1x256xi1>
    %cst_21 = arith.constant 0.000000e+00 : f32
    %24 = vector.shape_cast %23 : vector<1x256xi1> to vector<1x256xi1>
    %25 = vector.broadcast %24 : vector<1x256xi1> to vector<8x256xi1>
    %26 = vector.broadcast %cst_21 : f32 to vector<8x256xf32>
    %27 = arith.select %25, %12, %26 : vector<8x256xi1>, vector<8x256xf32>
    %c16_i32 = arith.constant 16 : i32
    %28 = tpu.dynamic_rotate %11 by %c16_i32 dim 1 : vector<8x256xf32>, i32 -> vector<8x256xf32>
    %c1_i32_22 = arith.constant 1 : i32
    %29 = vector.broadcast %c1_i32_22 : i32 to vector<1x256xi32>
    %30 = arith.cmpi sge, %2, %29 : vector<1x256xi32>
    %c17_i32_23 = arith.constant 17 : i32
    %31 = vector.broadcast %c17_i32_23 : i32 to vector<1x256xi32>
    %32 = arith.cmpi slt, %2, %31 : vector<1x256xi32>
    %33 = arith.andi %30, %32 : vector<1x256xi1>
    %c0_i32 = arith.constant 0 : i32
    %34 = vector.broadcast %c0_i32 : i32 to vector<1x256xi32>
    %35 = arith.cmpi sge, %3, %34 : vector<1x256xi32>
    %36 = arith.andi %33, %35 : vector<1x256xi1>
    %c16_i32_24 = arith.constant 16 : i32
    %37 = vector.broadcast %c16_i32_24 : i32 to vector<1x256xi32>
    %38 = arith.cmpi slt, %3, %37 : vector<1x256xi32>
    %39 = arith.andi %36, %38 : vector<1x256xi1>
    %cst_25 = arith.constant 0.000000e+00 : f32
    %40 = vector.shape_cast %39 : vector<1x256xi1> to vector<1x256xi1>
    %41 = vector.broadcast %40 : vector<1x256xi1> to vector<8x256xi1>
    %42 = vector.broadcast %cst_25 : f32 to vector<8x256xf32>
    %43 = arith.select %41, %28, %42 : vector<8x256xi1>, vector<8x256xf32>
    %c15_i32 = arith.constant 15 : i32
    %44 = tpu.dynamic_rotate %11 by %c15_i32 dim 1 : vector<8x256xf32>, i32 -> vector<8x256xf32>
    %c1_i32_26 = arith.constant 1 : i32
    %45 = vector.broadcast %c1_i32_26 : i32 to vector<1x256xi32>
    %46 = arith.cmpi sge, %2, %45 : vector<1x256xi32>
    %c17_i32_27 = arith.constant 17 : i32
    %47 = vector.broadcast %c17_i32_27 : i32 to vector<1x256xi32>
    %48 = arith.cmpi slt, %2, %47 : vector<1x256xi32>
    %49 = arith.andi %46, %48 : vector<1x256xi1>
    %c-1_i32 = arith.constant -1 : i32
    %50 = vector.broadcast %c-1_i32 : i32 to vector<1x256xi32>
    %51 = arith.cmpi sge, %3, %50 : vector<1x256xi32>
    %52 = arith.andi %49, %51 : vector<1x256xi1>
    %c15_i32_28 = arith.constant 15 : i32
    %53 = vector.broadcast %c15_i32_28 : i32 to vector<1x256xi32>
    %54 = arith.cmpi slt, %3, %53 : vector<1x256xi32>
    %55 = arith.andi %52, %54 : vector<1x256xi1>
    %cst_29 = arith.constant 0.000000e+00 : f32
    %56 = vector.shape_cast %55 : vector<1x256xi1> to vector<1x256xi1>
    %57 = vector.broadcast %56 : vector<1x256xi1> to vector<8x256xi1>
    %58 = vector.broadcast %cst_29 : f32 to vector<8x256xf32>
    %59 = arith.select %57, %44, %58 : vector<8x256xi1>, vector<8x256xf32>
    %c1_i32_30 = arith.constant 1 : i32
    %60 = tpu.dynamic_rotate %11 by %c1_i32_30 dim 1 : vector<8x256xf32>, i32 -> vector<8x256xf32>
    %c0_i32_31 = arith.constant 0 : i32
    %61 = vector.broadcast %c0_i32_31 : i32 to vector<1x256xi32>
    %62 = arith.cmpi sge, %2, %61 : vector<1x256xi32>
    %c16_i32_32 = arith.constant 16 : i32
    %63 = vector.broadcast %c16_i32_32 : i32 to vector<1x256xi32>
    %64 = arith.cmpi slt, %2, %63 : vector<1x256xi32>
    %65 = arith.andi %62, %64 : vector<1x256xi1>
    %c1_i32_33 = arith.constant 1 : i32
    %66 = vector.broadcast %c1_i32_33 : i32 to vector<1x256xi32>
    %67 = arith.cmpi sge, %3, %66 : vector<1x256xi32>
    %68 = arith.andi %65, %67 : vector<1x256xi1>
    %c17_i32_34 = arith.constant 17 : i32
    %69 = vector.broadcast %c17_i32_34 : i32 to vector<1x256xi32>
    %70 = arith.cmpi slt, %3, %69 : vector<1x256xi32>
    %71 = arith.andi %68, %70 : vector<1x256xi1>
    %cst_35 = arith.constant 0.000000e+00 : f32
    %72 = vector.shape_cast %71 : vector<1x256xi1> to vector<1x256xi1>
    %73 = vector.broadcast %72 : vector<1x256xi1> to vector<8x256xi1>
    %74 = vector.broadcast %cst_35 : f32 to vector<8x256xf32>
    %75 = arith.select %73, %60, %74 : vector<8x256xi1>, vector<8x256xf32>
    %c255_i32 = arith.constant 255 : i32
    %76 = tpu.dynamic_rotate %11 by %c255_i32 dim 1 : vector<8x256xf32>, i32 -> vector<8x256xf32>
    %c0_i32_36 = arith.constant 0 : i32
    %77 = vector.broadcast %c0_i32_36 : i32 to vector<1x256xi32>
    %78 = arith.cmpi sge, %2, %77 : vector<1x256xi32>
    %c16_i32_37 = arith.constant 16 : i32
    %79 = vector.broadcast %c16_i32_37 : i32 to vector<1x256xi32>
    %80 = arith.cmpi slt, %2, %79 : vector<1x256xi32>
    %81 = arith.andi %78, %80 : vector<1x256xi1>
    %c-1_i32_38 = arith.constant -1 : i32
    %82 = vector.broadcast %c-1_i32_38 : i32 to vector<1x256xi32>
    %83 = arith.cmpi sge, %3, %82 : vector<1x256xi32>
    %84 = arith.andi %81, %83 : vector<1x256xi1>
    %c15_i32_39 = arith.constant 15 : i32
    %85 = vector.broadcast %c15_i32_39 : i32 to vector<1x256xi32>
    %86 = arith.cmpi slt, %3, %85 : vector<1x256xi32>
    %87 = arith.andi %84, %86 : vector<1x256xi1>
    %cst_40 = arith.constant 0.000000e+00 : f32
    %88 = vector.shape_cast %87 : vector<1x256xi1> to vector<1x256xi1>
    %89 = vector.broadcast %88 : vector<1x256xi1> to vector<8x256xi1>
    %90 = vector.broadcast %cst_40 : f32 to vector<8x256xf32>
    %91 = arith.select %89, %76, %90 : vector<8x256xi1>, vector<8x256xf32>
    %c241_i32 = arith.constant 241 : i32
    %92 = tpu.dynamic_rotate %11 by %c241_i32 dim 1 : vector<8x256xf32>, i32 -> vector<8x256xf32>
    %c-1_i32_41 = arith.constant -1 : i32
    %93 = vector.broadcast %c-1_i32_41 : i32 to vector<1x256xi32>
    %94 = arith.cmpi sge, %2, %93 : vector<1x256xi32>
    %c15_i32_42 = arith.constant 15 : i32
    %95 = vector.broadcast %c15_i32_42 : i32 to vector<1x256xi32>
    %96 = arith.cmpi slt, %2, %95 : vector<1x256xi32>
    %97 = arith.andi %94, %96 : vector<1x256xi1>
    %c1_i32_43 = arith.constant 1 : i32
    %98 = vector.broadcast %c1_i32_43 : i32 to vector<1x256xi32>
    %99 = arith.cmpi sge, %3, %98 : vector<1x256xi32>
    %100 = arith.andi %97, %99 : vector<1x256xi1>
    %c17_i32_44 = arith.constant 17 : i32
    %101 = vector.broadcast %c17_i32_44 : i32 to vector<1x256xi32>
    %102 = arith.cmpi slt, %3, %101 : vector<1x256xi32>
    %103 = arith.andi %100, %102 : vector<1x256xi1>
    %cst_45 = arith.constant 0.000000e+00 : f32
    %104 = vector.shape_cast %103 : vector<1x256xi1> to vector<1x256xi1>
    %105 = vector.broadcast %104 : vector<1x256xi1> to vector<8x256xi1>
    %106 = vector.broadcast %cst_45 : f32 to vector<8x256xf32>
    %107 = arith.select %105, %92, %106 : vector<8x256xi1>, vector<8x256xf32>
    %c240_i32 = arith.constant 240 : i32
    %108 = tpu.dynamic_rotate %11 by %c240_i32 dim 1 : vector<8x256xf32>, i32 -> vector<8x256xf32>
    %c-1_i32_46 = arith.constant -1 : i32
    %109 = vector.broadcast %c-1_i32_46 : i32 to vector<1x256xi32>
    %110 = arith.cmpi sge, %2, %109 : vector<1x256xi32>
    %c15_i32_47 = arith.constant 15 : i32
    %111 = vector.broadcast %c15_i32_47 : i32 to vector<1x256xi32>
    %112 = arith.cmpi slt, %2, %111 : vector<1x256xi32>
    %113 = arith.andi %110, %112 : vector<1x256xi1>
    %c0_i32_48 = arith.constant 0 : i32
    %114 = vector.broadcast %c0_i32_48 : i32 to vector<1x256xi32>
    %115 = arith.cmpi sge, %3, %114 : vector<1x256xi32>
    %116 = arith.andi %113, %115 : vector<1x256xi1>
    %c16_i32_49 = arith.constant 16 : i32
    %117 = vector.broadcast %c16_i32_49 : i32 to vector<1x256xi32>
    %118 = arith.cmpi slt, %3, %117 : vector<1x256xi32>
    %119 = arith.andi %116, %118 : vector<1x256xi1>
    %cst_50 = arith.constant 0.000000e+00 : f32
    %120 = vector.shape_cast %119 : vector<1x256xi1> to vector<1x256xi1>
    %121 = vector.broadcast %120 : vector<1x256xi1> to vector<8x256xi1>
    %122 = vector.broadcast %cst_50 : f32 to vector<8x256xf32>
    %123 = arith.select %121, %108, %122 : vector<8x256xi1>, vector<8x256xf32>
    %c239_i32 = arith.constant 239 : i32
    %124 = tpu.dynamic_rotate %11 by %c239_i32 dim 1 : vector<8x256xf32>, i32 -> vector<8x256xf32>
    %c-1_i32_51 = arith.constant -1 : i32
    %125 = vector.broadcast %c-1_i32_51 : i32 to vector<1x256xi32>
    %126 = arith.cmpi sge, %2, %125 : vector<1x256xi32>
    %c15_i32_52 = arith.constant 15 : i32
    %127 = vector.broadcast %c15_i32_52 : i32 to vector<1x256xi32>
    %128 = arith.cmpi slt, %2, %127 : vector<1x256xi32>
    %129 = arith.andi %126, %128 : vector<1x256xi1>
    %c-1_i32_53 = arith.constant -1 : i32
    %130 = vector.broadcast %c-1_i32_53 : i32 to vector<1x256xi32>
    %131 = arith.cmpi sge, %3, %130 : vector<1x256xi32>
    %132 = arith.andi %129, %131 : vector<1x256xi1>
    %c15_i32_54 = arith.constant 15 : i32
    %133 = vector.broadcast %c15_i32_54 : i32 to vector<1x256xi32>
    %134 = arith.cmpi slt, %3, %133 : vector<1x256xi32>
    %135 = arith.andi %132, %134 : vector<1x256xi1>
    %cst_55 = arith.constant 0.000000e+00 : f32
    %136 = vector.shape_cast %135 : vector<1x256xi1> to vector<1x256xi1>
    %137 = vector.broadcast %136 : vector<1x256xi1> to vector<8x256xi1>
    %138 = vector.broadcast %cst_55 : f32 to vector<8x256xf32>
    %139 = arith.select %137, %124, %138 : vector<8x256xi1>, vector<8x256xf32>
    %140 = tpu.concatenate %27, %43, %59, %75, %11, %91, %107, %123, %139 in 0 : vector<8x256xf32>, vector<8x256xf32>, vector<8x256xf32>, vector<8x256xf32>, vector<8x256xf32>, vector<8x256xf32>, vector<8x256xf32>, vector<8x256xf32>, vector<8x256xf32> -> vector<72x256xf32>
    %cst_56 = arith.constant dense<0.000000e+00> : vector<8x256xf32>
    %141 = tpu.matmul %4, %140, %cst_56 {dimension_numbers = #tpu.dot_dimension_numbers<[1], [0], [0], [1], [0, 0, 1, 1], [], []>} : vector<8x72xf32>, vector<72x256xf32>, vector<8x256xf32> -> vector<8x256xf32>
    %142 = vector.broadcast %5 : vector<8x1xf32> to vector<8x256xf32>
    %143 = arith.addf %141, %142 : vector<8x256xf32>
    %cst_57 = arith.constant 0.000000e+00 : f32
    %144 = vector.broadcast %cst_57 : f32 to vector<8x256xf32>
    %145 = arith.maximumf %143, %144 : vector<8x256xf32>
    %c17_i32_58 = arith.constant 17 : i32
    %146 = tpu.dynamic_rotate %145 by %c17_i32_58 dim 1 : vector<8x256xf32>, i32 -> vector<8x256xf32>
    %c1_i32_59 = arith.constant 1 : i32
    %147 = vector.broadcast %c1_i32_59 : i32 to vector<1x256xi32>
    %148 = arith.cmpi sge, %2, %147 : vector<1x256xi32>
    %c17_i32_60 = arith.constant 17 : i32
    %149 = vector.broadcast %c17_i32_60 : i32 to vector<1x256xi32>
    %150 = arith.cmpi slt, %2, %149 : vector<1x256xi32>
    %151 = arith.andi %148, %150 : vector<1x256xi1>
    %c1_i32_61 = arith.constant 1 : i32
    %152 = vector.broadcast %c1_i32_61 : i32 to vector<1x256xi32>
    %153 = arith.cmpi sge, %3, %152 : vector<1x256xi32>
    %154 = arith.andi %151, %153 : vector<1x256xi1>
    %c17_i32_62 = arith.constant 17 : i32
    %155 = vector.broadcast %c17_i32_62 : i32 to vector<1x256xi32>
    %156 = arith.cmpi slt, %3, %155 : vector<1x256xi32>
    %157 = arith.andi %154, %156 : vector<1x256xi1>
    %cst_63 = arith.constant 0.000000e+00 : f32
    %158 = vector.shape_cast %157 : vector<1x256xi1> to vector<1x256xi1>
    %159 = vector.broadcast %158 : vector<1x256xi1> to vector<8x256xi1>
    %160 = vector.broadcast %cst_63 : f32 to vector<8x256xf32>
    %161 = arith.select %159, %146, %160 : vector<8x256xi1>, vector<8x256xf32>
    %c16_i32_64 = arith.constant 16 : i32
    %162 = tpu.dynamic_rotate %145 by %c16_i32_64 dim 1 : vector<8x256xf32>, i32 -> vector<8x256xf32>
    %c1_i32_65 = arith.constant 1 : i32
    %163 = vector.broadcast %c1_i32_65 : i32 to vector<1x256xi32>
    %164 = arith.cmpi sge, %2, %163 : vector<1x256xi32>
    %c17_i32_66 = arith.constant 17 : i32
    %165 = vector.broadcast %c17_i32_66 : i32 to vector<1x256xi32>
    %166 = arith.cmpi slt, %2, %165 : vector<1x256xi32>
    %167 = arith.andi %164, %166 : vector<1x256xi1>
    %c0_i32_67 = arith.constant 0 : i32
    %168 = vector.broadcast %c0_i32_67 : i32 to vector<1x256xi32>
    %169 = arith.cmpi sge, %3, %168 : vector<1x256xi32>
    %170 = arith.andi %167, %169 : vector<1x256xi1>
    %c16_i32_68 = arith.constant 16 : i32
    %171 = vector.broadcast %c16_i32_68 : i32 to vector<1x256xi32>
    %172 = arith.cmpi slt, %3, %171 : vector<1x256xi32>
    %173 = arith.andi %170, %172 : vector<1x256xi1>
    %cst_69 = arith.constant 0.000000e+00 : f32
    %174 = vector.shape_cast %173 : vector<1x256xi1> to vector<1x256xi1>
    %175 = vector.broadcast %174 : vector<1x256xi1> to vector<8x256xi1>
    %176 = vector.broadcast %cst_69 : f32 to vector<8x256xf32>
    %177 = arith.select %175, %162, %176 : vector<8x256xi1>, vector<8x256xf32>
    %c15_i32_70 = arith.constant 15 : i32
    %178 = tpu.dynamic_rotate %145 by %c15_i32_70 dim 1 : vector<8x256xf32>, i32 -> vector<8x256xf32>
    %c1_i32_71 = arith.constant 1 : i32
    %179 = vector.broadcast %c1_i32_71 : i32 to vector<1x256xi32>
    %180 = arith.cmpi sge, %2, %179 : vector<1x256xi32>
    %c17_i32_72 = arith.constant 17 : i32
    %181 = vector.broadcast %c17_i32_72 : i32 to vector<1x256xi32>
    %182 = arith.cmpi slt, %2, %181 : vector<1x256xi32>
    %183 = arith.andi %180, %182 : vector<1x256xi1>
    %c-1_i32_73 = arith.constant -1 : i32
    %184 = vector.broadcast %c-1_i32_73 : i32 to vector<1x256xi32>
    %185 = arith.cmpi sge, %3, %184 : vector<1x256xi32>
    %186 = arith.andi %183, %185 : vector<1x256xi1>
    %c15_i32_74 = arith.constant 15 : i32
    %187 = vector.broadcast %c15_i32_74 : i32 to vector<1x256xi32>
    %188 = arith.cmpi slt, %3, %187 : vector<1x256xi32>
    %189 = arith.andi %186, %188 : vector<1x256xi1>
    %cst_75 = arith.constant 0.000000e+00 : f32
    %190 = vector.shape_cast %189 : vector<1x256xi1> to vector<1x256xi1>
    %191 = vector.broadcast %190 : vector<1x256xi1> to vector<8x256xi1>
    %192 = vector.broadcast %cst_75 : f32 to vector<8x256xf32>
    %193 = arith.select %191, %178, %192 : vector<8x256xi1>, vector<8x256xf32>
    %c1_i32_76 = arith.constant 1 : i32
    %194 = tpu.dynamic_rotate %145 by %c1_i32_76 dim 1 : vector<8x256xf32>, i32 -> vector<8x256xf32>
    %c0_i32_77 = arith.constant 0 : i32
    %195 = vector.broadcast %c0_i32_77 : i32 to vector<1x256xi32>
    %196 = arith.cmpi sge, %2, %195 : vector<1x256xi32>
    %c16_i32_78 = arith.constant 16 : i32
    %197 = vector.broadcast %c16_i32_78 : i32 to vector<1x256xi32>
    %198 = arith.cmpi slt, %2, %197 : vector<1x256xi32>
    %199 = arith.andi %196, %198 : vector<1x256xi1>
    %c1_i32_79 = arith.constant 1 : i32
    %200 = vector.broadcast %c1_i32_79 : i32 to vector<1x256xi32>
    %201 = arith.cmpi sge, %3, %200 : vector<1x256xi32>
    %202 = arith.andi %199, %201 : vector<1x256xi1>
    %c17_i32_80 = arith.constant 17 : i32
    %203 = vector.broadcast %c17_i32_80 : i32 to vector<1x256xi32>
    %204 = arith.cmpi slt, %3, %203 : vector<1x256xi32>
    %205 = arith.andi %202, %204 : vector<1x256xi1>
    %cst_81 = arith.constant 0.000000e+00 : f32
    %206 = vector.shape_cast %205 : vector<1x256xi1> to vector<1x256xi1>
    %207 = vector.broadcast %206 : vector<1x256xi1> to vector<8x256xi1>
    %208 = vector.broadcast %cst_81 : f32 to vector<8x256xf32>
    %209 = arith.select %207, %194, %208 : vector<8x256xi1>, vector<8x256xf32>
    %c255_i32_82 = arith.constant 255 : i32
    %210 = tpu.dynamic_rotate %145 by %c255_i32_82 dim 1 : vector<8x256xf32>, i32 -> vector<8x256xf32>
    %c0_i32_83 = arith.constant 0 : i32
    %211 = vector.broadcast %c0_i32_83 : i32 to vector<1x256xi32>
    %212 = arith.cmpi sge, %2, %211 : vector<1x256xi32>
    %c16_i32_84 = arith.constant 16 : i32
    %213 = vector.broadcast %c16_i32_84 : i32 to vector<1x256xi32>
    %214 = arith.cmpi slt, %2, %213 : vector<1x256xi32>
    %215 = arith.andi %212, %214 : vector<1x256xi1>
    %c-1_i32_85 = arith.constant -1 : i32
    %216 = vector.broadcast %c-1_i32_85 : i32 to vector<1x256xi32>
    %217 = arith.cmpi sge, %3, %216 : vector<1x256xi32>
    %218 = arith.andi %215, %217 : vector<1x256xi1>
    %c15_i32_86 = arith.constant 15 : i32
    %219 = vector.broadcast %c15_i32_86 : i32 to vector<1x256xi32>
    %220 = arith.cmpi slt, %3, %219 : vector<1x256xi32>
    %221 = arith.andi %218, %220 : vector<1x256xi1>
    %cst_87 = arith.constant 0.000000e+00 : f32
    %222 = vector.shape_cast %221 : vector<1x256xi1> to vector<1x256xi1>
    %223 = vector.broadcast %222 : vector<1x256xi1> to vector<8x256xi1>
    %224 = vector.broadcast %cst_87 : f32 to vector<8x256xf32>
    %225 = arith.select %223, %210, %224 : vector<8x256xi1>, vector<8x256xf32>
    %c241_i32_88 = arith.constant 241 : i32
    %226 = tpu.dynamic_rotate %145 by %c241_i32_88 dim 1 : vector<8x256xf32>, i32 -> vector<8x256xf32>
    %c-1_i32_89 = arith.constant -1 : i32
    %227 = vector.broadcast %c-1_i32_89 : i32 to vector<1x256xi32>
    %228 = arith.cmpi sge, %2, %227 : vector<1x256xi32>
    %c15_i32_90 = arith.constant 15 : i32
    %229 = vector.broadcast %c15_i32_90 : i32 to vector<1x256xi32>
    %230 = arith.cmpi slt, %2, %229 : vector<1x256xi32>
    %231 = arith.andi %228, %230 : vector<1x256xi1>
    %c1_i32_91 = arith.constant 1 : i32
    %232 = vector.broadcast %c1_i32_91 : i32 to vector<1x256xi32>
    %233 = arith.cmpi sge, %3, %232 : vector<1x256xi32>
    %234 = arith.andi %231, %233 : vector<1x256xi1>
    %c17_i32_92 = arith.constant 17 : i32
    %235 = vector.broadcast %c17_i32_92 : i32 to vector<1x256xi32>
    %236 = arith.cmpi slt, %3, %235 : vector<1x256xi32>
    %237 = arith.andi %234, %236 : vector<1x256xi1>
    %cst_93 = arith.constant 0.000000e+00 : f32
    %238 = vector.shape_cast %237 : vector<1x256xi1> to vector<1x256xi1>
    %239 = vector.broadcast %238 : vector<1x256xi1> to vector<8x256xi1>
    %240 = vector.broadcast %cst_93 : f32 to vector<8x256xf32>
    %241 = arith.select %239, %226, %240 : vector<8x256xi1>, vector<8x256xf32>
    %c240_i32_94 = arith.constant 240 : i32
    %242 = tpu.dynamic_rotate %145 by %c240_i32_94 dim 1 : vector<8x256xf32>, i32 -> vector<8x256xf32>
    %c-1_i32_95 = arith.constant -1 : i32
    %243 = vector.broadcast %c-1_i32_95 : i32 to vector<1x256xi32>
    %244 = arith.cmpi sge, %2, %243 : vector<1x256xi32>
    %c15_i32_96 = arith.constant 15 : i32
    %245 = vector.broadcast %c15_i32_96 : i32 to vector<1x256xi32>
    %246 = arith.cmpi slt, %2, %245 : vector<1x256xi32>
    %247 = arith.andi %244, %246 : vector<1x256xi1>
    %c0_i32_97 = arith.constant 0 : i32
    %248 = vector.broadcast %c0_i32_97 : i32 to vector<1x256xi32>
    %249 = arith.cmpi sge, %3, %248 : vector<1x256xi32>
    %250 = arith.andi %247, %249 : vector<1x256xi1>
    %c16_i32_98 = arith.constant 16 : i32
    %251 = vector.broadcast %c16_i32_98 : i32 to vector<1x256xi32>
    %252 = arith.cmpi slt, %3, %251 : vector<1x256xi32>
    %253 = arith.andi %250, %252 : vector<1x256xi1>
    %cst_99 = arith.constant 0.000000e+00 : f32
    %254 = vector.shape_cast %253 : vector<1x256xi1> to vector<1x256xi1>
    %255 = vector.broadcast %254 : vector<1x256xi1> to vector<8x256xi1>
    %256 = vector.broadcast %cst_99 : f32 to vector<8x256xf32>
    %257 = arith.select %255, %242, %256 : vector<8x256xi1>, vector<8x256xf32>
    %c239_i32_100 = arith.constant 239 : i32
    %258 = tpu.dynamic_rotate %145 by %c239_i32_100 dim 1 : vector<8x256xf32>, i32 -> vector<8x256xf32>
    %c-1_i32_101 = arith.constant -1 : i32
    %259 = vector.broadcast %c-1_i32_101 : i32 to vector<1x256xi32>
    %260 = arith.cmpi sge, %2, %259 : vector<1x256xi32>
    %c15_i32_102 = arith.constant 15 : i32
    %261 = vector.broadcast %c15_i32_102 : i32 to vector<1x256xi32>
    %262 = arith.cmpi slt, %2, %261 : vector<1x256xi32>
    %263 = arith.andi %260, %262 : vector<1x256xi1>
    %c-1_i32_103 = arith.constant -1 : i32
    %264 = vector.broadcast %c-1_i32_103 : i32 to vector<1x256xi32>
    %265 = arith.cmpi sge, %3, %264 : vector<1x256xi32>
    %266 = arith.andi %263, %265 : vector<1x256xi1>
    %c15_i32_104 = arith.constant 15 : i32
    %267 = vector.broadcast %c15_i32_104 : i32 to vector<1x256xi32>
    %268 = arith.cmpi slt, %3, %267 : vector<1x256xi32>
    %269 = arith.andi %266, %268 : vector<1x256xi1>
    %cst_105 = arith.constant 0.000000e+00 : f32
    %270 = vector.shape_cast %269 : vector<1x256xi1> to vector<1x256xi1>
    %271 = vector.broadcast %270 : vector<1x256xi1> to vector<8x256xi1>
    %272 = vector.broadcast %cst_105 : f32 to vector<8x256xf32>
    %273 = arith.select %271, %258, %272 : vector<8x256xi1>, vector<8x256xf32>
    %274 = tpu.concatenate %161, %177, %193, %209, %145, %225, %241, %257, %273 in 0 : vector<8x256xf32>, vector<8x256xf32>, vector<8x256xf32>, vector<8x256xf32>, vector<8x256xf32>, vector<8x256xf32>, vector<8x256xf32>, vector<8x256xf32>, vector<8x256xf32> -> vector<72x256xf32>
    %cst_106 = arith.constant dense<0.000000e+00> : vector<8x256xf32>
    %275 = tpu.matmul %6, %274, %cst_106 {dimension_numbers = #tpu.dot_dimension_numbers<[1], [0], [0], [1], [0, 0, 1, 1], [], []>} : vector<8x72xf32>, vector<72x256xf32>, vector<8x256xf32> -> vector<8x256xf32>
    %cst_107 = arith.constant dense<0.000000e+00> : vector<8x256xf32>
    %276 = tpu.matmul %8, %1, %cst_107 {dimension_numbers = #tpu.dot_dimension_numbers<[1], [0], [0], [1], [0, 0, 1, 1], [], []>} : vector<8x8xf32>, vector<8x256xf32>, vector<8x256xf32> -> vector<8x256xf32>
    %277 = arith.addf %275, %276 : vector<8x256xf32>
    %278 = arith.addf %7, %9 : vector<8x1xf32>
    %279 = vector.broadcast %278 : vector<8x1xf32> to vector<8x256xf32>
    %280 = arith.addf %277, %279 : vector<8x256xf32>
    %c0_108 = arith.constant 0 : index
    %c0_109 = arith.constant 0 : index
    %c0_110 = arith.constant 0 : index
    %281 = vector.load %arg10[%c0_108, %c0_109, %c0_110] : memref<1x8x256xf32, #tpu.memory_space<vmem>>, vector<1x8x256xf32>
    %282 = vector.shape_cast %281 : vector<1x8x256xf32> to vector<8x256xf32>
    %283 = vector.shape_cast %280 : vector<8x256xf32> to vector<1x8x256xf32>
    tpu.vector_store %arg10[%c0_108, %c0_109, %c0_110], %283 {strides = array<i32>} : memref<1x8x256xf32, #tpu.memory_space<vmem>>, vector<1x8x256xf32>,
    return
  }
  func.func @transform_0(%arg0: i32) -> (i32, i32, i32) {
    %c0_i32 = arith.constant 0 : i32
    %c0_i32_0 = arith.constant 0 : i32
    %c0_i32_1 = arith.constant 0 : i32
    return %arg0, %c0_i32, %c0_i32_0 : i32, i32, i32
  }
  func.func @transform_1(%arg0: i32) -> (i32, i32) {
    %c0_i32 = arith.constant 0 : i32
    %c0_i32_0 = arith.constant 0 : i32
    %c0_i32_1 = arith.constant 0 : i32
    return %c0_i32, %c0_i32_0 : i32, i32
  }
  func.func @transform_2(%arg0: i32) -> (i32, i32) {
    %c0_i32 = arith.constant 0 : i32
    %c0_i32_0 = arith.constant 0 : i32
    %c0_i32_1 = arith.constant 0 : i32
    return %c0_i32, %c0_i32_0 : i32, i32
  }
  func.func @transform_3(%arg0: i32) -> (i32, i32) {
    %c0_i32 = arith.constant 0 : i32
    %c0_i32_0 = arith.constant 0 : i32
    %c0_i32_1 = arith.constant 0 : i32
    return %c0_i32, %c0_i32_0 : i32, i32
  }
  func.func @transform_4(%arg0: i32) -> (i32, i32) {
    %c0_i32 = arith.constant 0 : i32
    %c0_i32_0 = arith.constant 0 : i32
    %c0_i32_1 = arith.constant 0 : i32
    return %c0_i32, %c0_i32_0 : i32, i32
  }
  func.func @transform_5(%arg0: i32) -> (i32, i32) {
    %c0_i32 = arith.constant 0 : i32
    %c0_i32_0 = arith.constant 0 : i32
    %c0_i32_1 = arith.constant 0 : i32
    return %c0_i32, %c0_i32_0 : i32, i32
  }
  func.func @transform_6(%arg0: i32) -> (i32, i32) {
    %c0_i32 = arith.constant 0 : i32
    %c0_i32_0 = arith.constant 0 : i32
    %c0_i32_1 = arith.constant 0 : i32
    return %c0_i32, %c0_i32_0 : i32, i32
  }
  func.func @transform_7(%arg0: i32) -> (i32, i32) {
    %c0_i32 = arith.constant 0 : i32
    %c0_i32_0 = arith.constant 0 : i32
    %c0_i32_1 = arith.constant 0 : i32
    return %c0_i32, %c0_i32_0 : i32, i32
  }
  func.func @transform_8(%arg0: i32) -> (i32, i32) {
    %c0_i32 = arith.constant 0 : i32
    %c0_i32_0 = arith.constant 0 : i32
    %c0_i32_1 = arith.constant 0 : i32
    return %c0_i32, %c0_i32_0 : i32, i32
  }
  func.func @transform_9(%arg0: i32) -> (i32, i32, i32) {
    %c0_i32 = arith.constant 0 : i32
    %c0_i32_0 = arith.constant 0 : i32
    %c0_i32_1 = arith.constant 0 : i32
    return %arg0, %c0_i32, %c0_i32_0 : i32, i32, i32
  }
}

</mosaic_0001>

<bundles_post_ra>
// kernel: tpu_custom_call.1
= control target key start
LH: loop header
LB: loop body
LE: loop exit
PB: predicated region body
PF: predicated region fallthrough
CT: control target
= control target key end

     0   :  { %14 = vsyncpa [#allocation3], 0  ;;  %s1558_s0 = inlined_call_operand.hbm [shape: f32[2,8,256], index: 0, kind: input, shape index: {}]   ;;  %s1559_s1 = inlined_call_operand.vmem [shape: s32[1,256], index: 1, kind: input, shape index: {}]   ;;  %s1560_s2 = inlined_call_operand.vmem [shape: s32[1,256], index: 2, kind: input, shape index: {}]   ;;  %s1561_s3 = inlined_call_operand.vmem [shape: f32[8,72], index: 3, kind: input, shape index: {}]   ;;  %s1562_s4 = inlined_call_operand.vmem [shape: f32[8,1], index: 4, kind: input, shape index: {}]   ;;  %s1563_s5 = inlined_call_operand.vmem [shape: f32[8,72], index: 5, kind: input, shape index: {}]   ;;  %s1564_s6 = inlined_call_operand.vmem [shape: f32[8,1], index: 6, kind: input, shape index: {}]   ;;  %s1565_s7 = inlined_call_operand.vmem [shape: f32[8,8], index: 7, kind: input, shape index: {}]   ;;  %s1566_s8 = inlined_call_operand.vmem [shape: f32[8,1], index: 8, kind: input, shape index: {}]   ;;  %s1567_s9 = inlined_call_operand.hbm [shape: f32[2,8,256], index: 9, kind: output, shape index: {}]  }
   0x1   :  { %16 = vsyncpa [#allocation3 + $0x1], 0 }
   0x2   :  { %17 = vsyncpa [#allocation4], 0 }
   0x3   :  { %19 = vsyncpa [#allocation4 + $0x1], 0  ;;  %s1075_s30 = smov 0   ;;  %s1077_s10 = smov 0  }
   0x4   :  { %s1079_s11 = smov 0   ;;  %s1081_s12 = smov 0  }
   0x5 LB: > { %1589 = sst [smem:[#allocation8_spill]] %s1010_s11  ;;  %s1096_s13 = sadd.s32 4294967295, %s1014_s12   ;;  %s1014_s12 = sphi %s1081_s12, %s1661_s12   ;;  %s1010_s11 = sphi %s1079_s11, %s1663_s11   ;;  %s1006_s10 = sphi %s1077_s10, %s1665_s10   ;;  %s1002_s30 = sphi %s1075_s30, %s1664_s30  }
   0x6   : > { %s807_s14 = sadd.s32 4294967294, %s1014_s12   ;;  %s1100_s15 = sadd.s32 1, %s1014_s12  }
   0x7   : > { %1590 = sst [smem:[#allocation9_spill]] %s1100_s15  ;;  %s32_s16 = sadd.s32 1, %s1010_s11 }
   0x8   : > { %s29_s17 = ssub.s32 %s1014_s12, %s1100_s15  ;;  %p39_p0 = scmp.ne.s32.totalorder %s1010_s11, %s1006_s10 }
   0x9   : > { %p30_p1 = scmp.eq.s32.totalorder %s29_s17, 0  ;;  %p40_p2 = scmp.eq.s32.totalorder %s1014_s12, 0 }
   0xa   : > { %p45_p3 = scmp.ne.s32.totalorder %s1006_s10, %s1002_s30  ;;  %p46_p4 = scmp.eq.s32.totalorder %s1096_s13, 0 }
   0xb   : > { %s1112_s18 = scalar_select %p30_p1, %s1010_s11, %s32_s16  }
   0xc   : > { %p1114_p5 = por %p40_p2, %p39_p0  ;;  %p1118_p6 = por %p46_p4, %p45_p3 }
   0xd   : > { %1591 = sst [smem:[#allocation10_spill]] %s1112_s18  ;;  %p237_p7 = scmp.eq.s32.totalorder %s1096_s13, 1 }
   0xe   : > { %p243_p8 = scmp.eq.s32.totalorder %s807_s14, 1  ;;  %p873_p10 = scmp.lt.s32.totalorder %s1014_s12, 2 }
   0xf   : > { %p1125_p11 = por %p237_p7, %p39_p0  ;;  %s287_s23 = sand.u32 1, %s1010_s11  }
  0x10   : > { %p1129_p12 = por %p243_p8, %p45_p3  ;;  %s859_s24 = sshll.u32 %s1014_s12, 4 }
  0x11   : > { %s810_s25 = sshll.u32 %s287_s23, 4  ;;  %s296_s28 = scalar_lea.hbm %s1558_s0, %s859_s24 }
  0x12   : > { %s298_s29 = sshll.u32 %s296_s28, 4  ;;  %s291_s14 = scalar_lea.vmem [#allocation2], %s810_s25  ;;  %s299_s29 = int_to_ptr.hbm [resolvable:$true] %s298_s29 }
  0x13   : > { %s300_s16 = sshll.u32 %s291_s14, 4  ;;  %p1140_p13 = pnand %p873_p10, %p1114_p5  ;;  %s301_s16 = int_to_ptr.vmem [resolvable:$true] %s300_s16 }
  0x14   : > { %p813_p0 = scmp.ge.s32.totalorder %s1014_s12, 1  ;;  %p305_p1 = scmp.lt.s32.totalorder %s1014_s12, 3 }
  0x15   : > { %s288_s18 = scalar_lea.sflag [#allocation3], %s287_s23  ;;  %s918_s11 = sshra.s32 %s299_s29, 4  ;;  %s919_s11 = int_to_ptr.hbm [resolvable:$true] %s918_s11 }
  0x16   : > { %s920_s15 = scalar_lea.hbm %s919_s11, 16  ;;  %p922_p3 = pneg %p1140_p13 }
  0x17   : > { %p921_p2 = scmp.ne.s32.totalorder %s919_s11, %s920_s15  ;;  %s925_s19 = scalar_lea.hbm %s1558_s0, 32 }
  0x18   : > { %p926_p5 = scmp.lt.s32.totalorder %s919_s11, %s1558_s0  ;;  %p927_p8 = scmp.lt.s32.totalorder %s925_s19, %s920_s15 }
  0x19   : > { %p923_p4 = pnand %p922_p3, %p921_p2 }
  0x1a   : > { %p928_p10 = por %p927_p8, %p926_p5 }
  0x1b   : > { %p924_p7 = pneg %p923_p4 }
  0x1d   : > { %p929_p9 = pnand %p928_p10, %p924_p7 }
  0x1f   : > { %932 = shalt.err (!%p929_p9)
}
  0x20   : > { %868 = dma.hbm_to_vmem [thread:$0]  (!%p1140_p13), %s299_s29, 256, %s301_s16, %s288_s18  }
  0x21   : > { %p306_p2 = pnand %p813_p0, %p305_p1 }
  0x22   : > { %s1161_s23 = sand.u32 (!%p306_p2), 1, %s1006_s10  }
  0x23   : > { %309 = sbr.rel (%p306_p2) target bundleno = 623 (0x26f), region = 56  ;;  %s814_s11 = sshll.u32 (!%p306_p2), %s1161_s23, 4 }
  0x24   : > { %s312_s15 = scalar_lea.sflag (!%p306_p2), [#allocation3], %s1161_s23  ;;  %s315_s28 = scalar_lea.vmem (!%p306_p2), [#allocation2], %s814_s11 }
  0x28   : > { %993 = dma.done.wait (%p1118_p6), %s312_s15, 256  }
  0x29   : > { %995 = vsyncadd (%p1118_p6), %s312_s15, 4294967040  ;;  %v351_v0 = vld [vmem:[%s315_s28] sm:$0xff]  ;;  %v352_v1 = vld [vmem:[%s315_s28 + $0x8] sm:$0xff]  ;;  %s1016_s18 = smov 112   ;;  %s1017_s29 = smov 111   ;;  %v1024_v4 = vmov 0   ;;  %v367_v8 = vlaneseq }
  0x2a   : > { %v1171_v2 = vmax.f32 %v351_v0, 0.0  ;;  %642 = vmatpush.msra.mxu2 %v351_v0  ;;  %662 = vmatpush.msra.mxu3 %v352_v1  ;;  %s1018_s14 = smov 113   ;;  %v1179_v3 = vmax.f32 %v352_v1, 0.0  ;;  %s1019_s20 = smov 127   ;;  %v353_v5 = vld [vmem:[%s1559_s1] sm:$0x3] }
  0x2b   : > { %s1020_s16 = smov 1   ;;  %s1021_s17 = smov 15   ;;  %916 = vset.pattern.permute.xlu1 %v1024_v4  ;;  %917 = vset.pattern.permute.xlu0 %v1024_v4  ;;  %v1215_v6 = vld [vmem:[%s1560_s2] sm:$0x3]  ;;  %vm464_vm0 = vcmp.ge.s32.totalorder %v353_v5, 4294967295  ;;  %vm465_vm1 = vcmp.lt.s32.totalorder %v353_v5, 15 }
  0x2c   : > { %476 = vrot.lane.b32.xlu1 %v1171_v2, %s1016_s18  ;;  %492 = vrot.lane.b32.xlu0 %v1171_v2, %s1017_s29  ;;  %s1022_s24 = smov 16   ;;  %s1023_s25 = smov 17   ;;  %vm411_vm2 = vcmp.ge.s32.totalorder %v1215_v6, 4294967295  ;;  %vm466_vm3 = vmand %vm464_vm0, %vm465_vm1  ;;  %vm1573_vm4 = vcmp.ge.s32.totalorder %v1215_v6, 0  ;;  %vm413_vm5 = vcmp.lt.s32.totalorder %v1215_v6, 15  ;;  %vm1575_vm7 = vcmp.ge.s32.totalorder %v1215_v6, 1 }
  0x2d   : > { %457 = vrot.lane.b32.xlu2 %v1171_v2, %s1018_s14  ;;  %vm499_vm6 = vmand %vm466_vm3, %vm411_vm2  ;;  %vm1571_vm8 = vcmp.lt.s32.totalorder %v1215_v6, 16  ;;  %vm429_vm11 = vcmp.ge.s32.totalorder %v353_v5, 0  ;;  %vm430_vm12 = vcmp.lt.s32.totalorder %v353_v5, 16  ;;  %vm1578_vm13 = vcmp.lt.s32.totalorder %v1215_v6, 17  ;;  %v356_v39 = vld [vmem:[%s1562_s4] sm:$0xff]  ;;  %s860_s15 = sshll.u32 %s1096_s13, 4 }
  0x2e   : > { %vm483_vm9 = vmand %vm466_vm3, %vm1573_vm4  ;;  %v1240_v13 = vand.u32 127, %v367_v8  ;;  %v1613_v43 = vmov 0  ;;  %v1615_v44 = vmov 0  ;;  %v1619_v56 = vmov 0  ;;  %v358_v23 = vld [vmem:[%s1564_s6] sm:$0xff]  ;;  %s732_s26 = scalar_lea.hbm %s1567_s9, %s860_s15  ;;  %s350_s27 = scalar_lea.vmem [#allocation5], %s814_s11 }
  0x2f   : > { %vm500_vm10 = vmand %vm499_vm6, %vm413_vm5  ;;  %v1621_v57 = vmov 0  ;;  %v360_v24 = vld [vmem:[%s1566_s8] sm:$0xff]  ;;  %s721_s13 = scalar_lea.sflag [#allocation4], %s1161_s23  ;;  %s968_s11 = scalar_lea.hbm %s1567_s9, 32 }
  0x30   : > { %vm467_vm14 = vmand %vm466_vm3, %vm1575_vm7  ;;  %v501_v12 = vsel %vm500_vm10, 1, %v1024_v4  ;;  %vm373_vm10 = vcmp.lt.s32.totalorder %v353_v5, 17  ;;  %v357_v60 = vld [vmem:[%s1563_s5] sm:$0xff] }
  0x31   : > { %vm484_vm15 = vmand %vm483_vm9, %vm1571_vm8  ;;  %v502_v15 = vperm.slane %v501_v12, 0  ;;  %v503_v16 = vperm.slane %v501_v12, 1  ;;  %vm372_vm9 = vcmp.ge.s32.totalorder %v353_v5, 1 }
  0x32   : > { %vm1233_vm0 = vmand %vm429_vm11, %vm430_vm12  ;;  %v485_v14 = vsel %vm484_vm15, 1, %v1024_v4  ;;  %vm1572_vm11 = vcmp.lt.s32.totalorder %v1240_v13, 111  ;;  %vm1574_vm15 = vcmp.lt.s32.totalorder %v1240_v13, 112 }
  0x33   : > { %vm468_vm1 = vmand %vm467_vm14, %vm1578_vm13  ;;  %v486_v19 = vperm.slane %v485_v14, 0  ;;  %v487_v20 = vperm.slane %v485_v14, 1  ;;  %vm1251_vm12 = vcmp.eq.s32.totalorder %v502_v15, 1  ;;  %vm1255_vm14 = vcmp.eq.s32.totalorder %v503_v16, 1 }
  0x34   : > { %478 = vrot.lane.b32.xlu1 %v1179_v3, %s1016_s18  ;;  %494 = vrot.lane.b32.xlu0 %v1179_v3, %s1017_s29  ;;  %vm448_vm3 = vmand %vm1233_vm0, %vm411_vm2  ;;  %v469_v17 = vsel %vm468_vm1, 1, %v1024_v4 }
  0x35   : > { %459 = vrot.lane.b32.xlu2 %v1179_v3, %s1018_s14  ;;  %vm449_vm6 = vmand %vm448_vm3, %vm413_vm5  ;;  %v470_v21 = vperm.slane %v469_v17, 0  ;;  %v471_v22 = vperm.slane %v469_v17, 1  ;;  %vm1269_vm3 = vcmp.eq.s32.totalorder %v486_v19, 1  ;;  %vm1273_vm8 = vcmp.eq.s32.totalorder %v487_v20, 1  ;;  %v355_v19 = vld [vmem:[%s1561_s3] sm:$0xff] }
  0x36   : > { %v450_v27 = vsel %vm449_vm6, 1, %v1024_v4  ;;  %vm1261_vm1 = vmand %vm372_vm9, %vm373_vm10  ;;  %vm1576_vm6 = vcmp.lt.s32.totalorder %v1240_v13, 113 }
  0x37   : > { %vm1282_vm9 = vcmp.eq.s32.totalorder %v470_v21, 1  ;;  %vm1286_vm10 = vcmp.eq.s32.totalorder %v471_v22, 1  ;;  %v451_v37 = vperm.slane %v450_v27, 0  ;;  %v452_v38 = vperm.slane %v450_v27, 1  ;;  %vm412_vm4 = vmand %vm1261_vm1, %vm411_vm2 }
  0x3c   : > { %443 = vrot.lane.b32.xlu1 %v1179_v3, %s1019_s20  ;;  %441 = vrot.lane.b32.xlu0 %v1171_v2, %s1019_s20 }
  0x3d   : > { %422 = vrot.lane.b32.xlu2 %v1171_v2, %s1020_s16 }
  0x44   : > { %404 = vrot.lane.b32.xlu1 %v1171_v2, %s1021_s17  ;;  %424 = vrot.lane.b32.xlu0 %v1179_v3, %s1020_s16 }
  0x45   : > { %406 = vrot.lane.b32.xlu2 %v1179_v3, %s1021_s17 }
  0x4c   : > { %388 = vrot.lane.b32.xlu1 %v1179_v3, %s1022_s24  ;;  %386 = vrot.lane.b32.xlu0 %v1171_v2, %s1022_s24 }
  0x4d   : > { %363 = vrot.lane.b32.xlu2 %v1171_v2, %s1023_s25 }
  0x54   : > { %365 = vrot.lane.b32.xlu0 %v1179_v3, %s1023_s25  ;;  %510 = vperm.xlu1 %916, %v356_v39  }
  0x87   : > { %v458_v7 = vpop.permute.xlu2 %457 }
  0x8f   : > { %v460_v18 = vpop.permute.xlu2 %459 }
  0x90   : > { %v462_v41 = vsel %vm1576_vm6, %v458_v7, %v460_v18  ;;  %v463_v42 = vsel %vm1576_vm6, %v460_v18, %v458_v7  ;;  %vm1326_vm6 = vcmp.eq.s32.totalorder %v452_v38, 1 }
  0x91   : > { %v1616_v44 = vsel %vm1326_vm6, 4294967295, %v1615_v44 }
  0x97   : > { %v423_v40 = vpop.permute.xlu2 %422 }
  0x9e   : > { %v477_v10 = vpop.permute.xlu1 %476  ;;  %v493_v11 = vpop.permute.xlu0 %492 }
  0x9f   : > { %v407_v55 = vpop.permute.xlu2 %406 }
  0xa6   : > { %v479_v25 = vpop.permute.xlu1 %478  ;;  %v495_v26 = vpop.permute.xlu0 %494 }
  0xa7   : > { %v497_v29 = vsel %vm1572_vm11, %v493_v11, %v495_v26  ;;  %v498_v30 = vsel %vm1572_vm11, %v495_v26, %v493_v11  ;;  %vm432_vm11 = vmand %vm1233_vm0, %vm1575_vm7  ;;  %v481_v35 = vsel %vm1574_vm15, %v477_v10, %v479_v25  ;;  %v482_v36 = vsel %vm1574_vm15, %v479_v25, %v477_v10  ;;  %v364_v16 = vpop.permute.xlu2 %363 }
  0xa8   : > { %816 = vmatpush.msk.msra.mxu0 %vm1251_vm12, %v497_v29  ;;  %825 = vmatpush.msk.msra.mxu1 %vm1255_vm14, %v498_v30  ;;  %vm433_vm2 = vmand %vm432_vm11, %vm1578_vm13  ;;  %vm1577_vm0 = vcmp.lt.s32.totalorder %v1240_v13, 127  ;;  %vm1322_vm7 = vcmp.eq.s32.totalorder %v451_v37, 1  ;;  %vm1618_vm11 = vcmp.lt.s32.totalorder %v1215_v6, 16  ;;  %v359_v37 = vld [vmem:[%s1565_s7] sm:$0xff] }
  0xa9   : > { %vm414_vm15 = vmand %vm412_vm4, %vm413_vm5  ;;  %v1614_v43 = vsel %vm1322_vm7, 4294967295, %v1613_v43  ;;  %v434_v47 = vsel %vm433_vm2, 1, %v1024_v4  ;;  %vm1617_vm4 = vcmp.ge.s32.totalorder %v1215_v6, 0  ;;  %vm1581_vm2 = vcmp.lt.s32.totalorder %v1240_v13, 1 }
  0xaa   : > { %817 = vmatpush.msk.msra.mxu0 %vm1269_vm3, %v481_v35  ;;  %826 = vmatpush.msk.msra.mxu1 %vm1273_vm8, %v482_v36  ;;  %v415_v50 = vsel %vm414_vm15, 1, %v1024_v4  ;;  %vm394_vm5 = vmand %vm1261_vm1, %vm1617_vm4  ;;  %v435_v51 = vperm.slane %v434_v47, 0  ;;  %v436_v52 = vperm.slane %v434_v47, 1  ;;  %v710_v47 = vadd.f32 %v360_v24, %v358_v23 }
  0xab   : > { %v416_v53 = vperm.slane %v415_v50, 0  ;;  %v417_v54 = vperm.slane %v415_v50, 1  ;;  %vm396_vm15 = vmand %vm394_vm5, %vm1618_vm11  ;;  %vm1627_vm11 = vcmp.ge.s32.totalorder %v1215_v6, 1 }
  0xac   : > { %818 = vmatpush.msk.msra.mxu0 %vm1282_vm9, %v462_v41  ;;  %827 = vmatpush.msk.msra.mxu1 %vm1286_vm10, %v463_v42  ;;  %vm1350_vm13 = vcmp.eq.s32.totalorder %v435_v51, 1  ;;  %vm1354_vm4 = vcmp.eq.s32.totalorder %v436_v52, 1  ;;  %v397_v62 = vsel %vm396_vm15, 1, %v1024_v4  ;;  %vm376_vm15 = vmand %vm1261_vm1, %vm1627_vm11  ;;  %vm1586_vm1 = vcmp.lt.s32.totalorder %v1240_v13, 17 }
  0xad   : > { %v1620_v56 = vsel %vm1350_vm13, 4294967295, %v1619_v56  ;;  %v1622_v57 = vsel %vm1354_vm4, 4294967295, %v1621_v57  ;;  %vm1362_vm5 = vcmp.eq.s32.totalorder %v417_v54, 1  ;;  %v399_v5 = vperm.slane %v397_v62, 1 }
  0xae   : > { %v444_v45 = vpop.permute.xlu1 %443  ;;  %v442_v46 = vpop.permute.xlu0 %441  ;;  %vm1585_vm11 = vcmask 588800  }
  0xaf   : > { %v446_v48 = vsel %vm1577_vm0, %v442_v46, %v444_v45  ;;  %v447_v49 = vsel %vm1577_vm0, %v444_v45, %v442_v46  ;;  %vm1580_vm0 = vcmp.lt.s32.totalorder %v1240_v13, 15 }
  0xb0   : > { %819 = vmatpush.msk.msra.mxu0 %vm1322_vm7, %v446_v48  ;;  %828 = vmatpush.msk.msra.mxu1 %vm1326_vm6, %v447_v49  ;;  %vm1358_vm6 = vcmp.eq.s32.totalorder %v416_v53, 1 }
  0xb2   : > { %528 = vmatpush.msra.mxu0 %v1171_v2  ;;  %548 = vmatpush.msra.mxu1 %v1179_v3  ;;  %v398_v3 = vperm.slane %v397_v62, 0 }
  0xb4   : > { %vm1390_vm7 = vcmp.eq.s32.totalorder %v398_v3, 1 }
  0xb6   : > { %v405_v58 = vpop.permute.xlu1 %404  ;;  %v425_v59 = vpop.permute.xlu0 %424 }
  0xb7   : > { %v428_v63 = vsel %vm1581_vm2, %v425_v59, %v423_v40  ;;  %v427_v0 = vsel %vm1581_vm2, %v423_v40, %v425_v59  ;;  %v410_v1 = vsel %vm1580_vm0, %v407_v55, %v405_v58  ;;  %v409_v2 = vsel %vm1580_vm0, %v405_v58, %v407_v55 }
  0xb8   : > { %820 = vmatpush.msk.msra.mxu0 %vm1350_vm13, %v428_v63  ;;  %829 = vmatpush.msk.msra.mxu1 %vm1354_vm4, %v427_v0  ;;  %vm1628_vm0 = vcmp.lt.s32.totalorder %v1215_v6, 17  ;;  %vm1587_vm13 = vcmp.lt.s32.totalorder %v1240_v13, 16  ;;  %vm1394_vm4 = vcmp.eq.s32.totalorder %v399_v5, 1 }
  0xb9   : > { %vm378_vm2 = vmand %vm376_vm15, %vm1628_vm0  ;;  %vm623_vm15 = vcmask 64512  }
  0xba   : > { %821 = vmatpush.msk.msra.mxu0 %vm1358_vm6, %v410_v1  ;;  %830 = vmatpush.msk.msra.mxu1 %vm1362_vm5, %v409_v2  ;;  %v379_v11 = vsel %vm378_vm2, 1, %v1024_v4  ;;  %v1635_v4 = vmov 0 }
  0xbb   : > { %v380_v14 = vperm.slane %v379_v11, 0  ;;  %v381_v15 = vperm.slane %v379_v11, 1  ;;  %834 = vmatmul.msk.f32.vlgmr.msra.gmra.mxu2 %vm623_vm15, %v359_v37  ;;  %835 = vmatmul.msk.f32.vlgmr.msra.gmra.mxu3 %vm623_vm15, %v359_v37  ;;  %vm1651_vm15 = vcmp.lt.s32.totalorder %v1240_v13, 15 }
  0xbd   : > { %vm1408_vm0 = vcmp.eq.s32.totalorder %v380_v14, 1  ;;  %vm1412_vm2 = vcmp.eq.s32.totalorder %v381_v15, 1 }
  0xbe   : > { %v389_v9 = vpop.permute.xlu1 %388  ;;  %v387_v10 = vpop.permute.xlu0 %386  ;;  %v1636_v4 = vsel %vm1412_vm2, 4294967295, %v1635_v4 }
  0xbf   : > { %v392_v12 = vsel %vm1587_vm13, %v389_v9, %v387_v10  ;;  %v391_v6 = vsel %vm1587_vm13, %v387_v10, %v389_v9  ;;  %vm1639_vm13 = vcmp.lt.s32.totalorder %v1240_v13, 112 }
  0xc0   : > { %822 = vmatpush.msk.msra.mxu0 %vm1390_vm7, %v392_v12  ;;  %831 = vmatpush.msk.msra.mxu1 %vm1394_vm4, %v391_v6 }
  0xc6   : > { %v366_v18 = vpop.permute.xlu0 %365  ;;  %v511_v22 = vpop.permute.xlu1 %510 }
  0xc7   : > { %v371_v20 = vsel %vm1586_vm1, %v366_v18, %v364_v16  ;;  %v370_v21 = vsel %vm1586_vm1, %v364_v16, %v366_v18 }
  0xc8   : > { %823 = vmatpush.msk.msra.mxu0 %vm1408_vm0, %v371_v20  ;;  %832 = vmatpush.msk.msra.mxu1 %vm1412_vm2, %v370_v21  ;;  %vm1640_vm2 = vmmov %vm1639_vm13 }
  0xc9   : > { %824 = vmatmul.msk.f32.vlgmr.msra.gmra.mxu0 %vm1585_vm11, %v355_v19  ;;  %833 = vmatmul.msk.f32.vlgmr.msra.gmra.mxu1 %vm1585_vm11, %v355_v19  ;;  %vm1637_vm11 = vcmp.lt.s32.totalorder %v1240_v13, 111 }
  0xca   : > { %vm1638_vm1 = vmmov %vm1637_vm11 }
 0x13e   : > { %v644_v2 = vpop.f32.mrf.mxu2  ;;  %v664_v3 = vpop.f32.mrf.mxu3 }
 0x146   : > { %v534_v25 = vpop.f32.mrf.mxu0  ;;  %v554_v26 = vpop.f32.mrf.mxu1 }
 0x147   : > { %v535_v27 = vadd.f32 %v534_v25, %v511_v22  ;;  %v555_v28 = vadd.f32 %v554_v26, %v511_v22 }
 0x149   : > { %v557_v29 = vmax.f32 %v535_v27, 0.0  ;;  %v558_v30 = vmax.f32 %v555_v28, 0.0 }
 0x14b   : > { %607 = vrot.lane.b32.xlu1 %v557_v29, %s1016_s18  ;;  %615 = vrot.lane.b32.xlu2 %v557_v29, %s1017_s29 }
 0x14c   : > { %617 = vrot.lane.b32.xlu0 %v558_v30, %s1017_s29  ;;  %s736_s29 = sshll.u32 %s732_s26, 4  ;;  %s737_s29 = int_to_ptr.hbm [resolvable:$true] %s736_s29 }
 0x153   : > { %601 = vrot.lane.b32.xlu1 %v558_v30, %s1018_s14  ;;  %609 = vrot.lane.b32.xlu2 %v558_v30, %s1016_s18  ;;  %s734_s18 = sshll.u32 %s350_s27, 4  ;;  %s735_s18 = int_to_ptr.vmem [resolvable:$true] %s734_s18 }
 0x154   : > { %599 = vrot.lane.b32.xlu0 %v557_v29, %s1018_s14  ;;  %s962_s14 = sshra.s32 %s737_s29, 4  ;;  %s963_s14 = int_to_ptr.hbm [resolvable:$true] %s962_s14 }
 0x155   : > { %p969_p0 = scmp.lt.s32.totalorder %s963_s14, %s1567_s9 }
 0x15b   : > { %583 = vrot.lane.b32.xlu1 %v557_v29, %s1020_s16  ;;  %591 = vrot.lane.b32.xlu2 %v557_v29, %s1019_s20 }
 0x15c   : > { %593 = vrot.lane.b32.xlu0 %v558_v30, %s1019_s20  ;;  %s964_s20 = scalar_lea.hbm %s963_s14, 16 }
 0x15d   : > { %p965_p6 = scmp.ne.s32.totalorder %s963_s14, %s964_s20  ;;  %p970_p1 = scmp.lt.s32.totalorder %s968_s11, %s964_s20 }
 0x15f   : > { %p966_p9 = pnand %p965_p6, %p1125_p11  ;;  %p971_p3 = por %p970_p1, %p969_p0 }
 0x161   : > { %p967_p13 = pneg %p966_p9 }
 0x163   : > { %577 = vrot.lane.b32.xlu1 %v558_v30, %s1021_s17  ;;  %585 = vrot.lane.b32.xlu2 %v558_v30, %s1020_s16  ;;  %p972_p4 = pnand %p971_p3, %p967_p13 }
 0x164   : > { %575 = vrot.lane.b32.xlu0 %v557_v29, %s1021_s17 }
 0x16b   : > { %559 = vrot.lane.b32.xlu1 %v557_v29, %s1023_s25  ;;  %567 = vrot.lane.b32.xlu2 %v557_v29, %s1022_s24 }
 0x16c   : > { %569 = vrot.lane.b32.xlu0 %v558_v30, %s1022_s24 }
 0x173   : > { %561 = vrot.lane.b32.xlu2 %v558_v30, %s1023_s25 }
 0x174   : > { %713 = vperm.xlu0 %917, %v710_v47  }
 0x1a5   : > { %v616_v35 = vpop.permute.xlu2 %615 }
 0x1ad   : > { %v610_v36 = vpop.permute.xlu2 %609 }
 0x1b5   : > { %v592_v46 = vpop.permute.xlu2 %591 }
 0x1bd   : > { %v608_v38 = vpop.permute.xlu1 %607  ;;  %v586_v32 = vpop.permute.xlu2 %585 }
 0x1be   : > { %v618_v39 = vpop.permute.xlu0 %617  ;;  %v611_v42 = vsel %vm1639_vm13, %v608_v38, %v610_v36  ;;  %v612_v45 = vsel %vm1640_vm2, %v610_v36, %v608_v38  ;;  %vm1641_vm13 = vcmp.lt.s32.totalorder %v1240_v13, 113  ;;  %vm1649_vm2 = vnez %v1620_v56 }
 0x1bf   : > { %v619_v40 = vsel %vm1637_vm11, %v616_v35, %v618_v39  ;;  %v620_v41 = vsel %vm1638_vm1, %v618_v39, %v616_v35  ;;  %vm1646_vm1 = vnez %v1616_v44  ;;  %vm1650_vm11 = vnez %v1622_v57 }
 0x1c0   : > { %836 = vmatpush.msk.msrb.mxu2 %vm1251_vm12, %v619_v40  ;;  %845 = vmatpush.msk.msrb.mxu3 %vm1255_vm14, %v620_v41  ;;  %vm1642_vm12 = vmmov %vm1641_vm13 }
 0x1c2   : > { %837 = vmatpush.msk.msrb.mxu2 %vm1269_vm3, %v611_v42  ;;  %846 = vmatpush.msk.msrb.mxu3 %vm1273_vm8, %v612_v45  ;;  %vm1643_vm8 = vcmp.lt.s32.totalorder %v1240_v13, 127  ;;  %vm1645_vm3 = vnez %v1614_v43 }
 0x1c3   : > { %vm1644_vm14 = vmmov %vm1643_vm8 }
 0x1c5   : > { %v602_v48 = vpop.permute.xlu1 %601  ;;  %v568_v43 = vpop.permute.xlu2 %567 }
 0x1c6   : > { %v600_v49 = vpop.permute.xlu0 %599 }
 0x1c7   : > { %v603_v50 = vsel %vm1641_vm13, %v600_v49, %v602_v48  ;;  %v604_v31 = vsel %vm1642_vm12, %v602_v48, %v600_v49  ;;  %vm1652_vm13 = vmmov %vm1651_vm15  ;;  %vm1653_vm12 = vcmp.lt.s32.totalorder %v1240_v13, 16 }
 0x1c8   : > { %838 = vmatpush.msk.msrb.mxu2 %vm1282_vm9, %v603_v50  ;;  %847 = vmatpush.msk.msrb.mxu3 %vm1286_vm10, %v604_v31  ;;  %vm1647_vm9 = vcmp.lt.s32.totalorder %v1240_v13, 1 }
 0x1c9   : > { %vm1648_vm10 = vmmov %vm1647_vm9 }
 0x1cd   : > { %v584_v51 = vpop.permute.xlu1 %583  ;;  %v562_v0 = vpop.permute.xlu2 %561 }
 0x1ce   : > { %v594_v52 = vpop.permute.xlu0 %593  ;;  %v588_v33 = vsel %vm1647_vm9, %v586_v32, %v584_v51  ;;  %v587_v34 = vsel %vm1648_vm10, %v584_v51, %v586_v32 }
 0x1cf   : > { %v595_v53 = vsel %vm1643_vm8, %v592_v46, %v594_v52  ;;  %v596_v54 = vsel %vm1644_vm14, %v594_v52, %v592_v46  ;;  %vm1654_vm8 = vmmov %vm1653_vm12  ;;  %vm1657_vm14 = vnez %v1636_v4 }
 0x1d0   : > { %839 = vmatpush.msk.msrb.mxu2 %vm1645_vm3, %v595_v53  ;;  %848 = vmatpush.msk.msrb.mxu3 %vm1646_vm1, %v596_v54 }
 0x1d2   : > { %681 = vmatpush.msrb.mxu2 %v557_v29  ;;  %701 = vmatpush.msrb.mxu3 %v558_v30 }
 0x1d4   : > { %840 = vmatpush.msk.msrb.mxu2 %vm1649_vm2, %v588_v33  ;;  %849 = vmatpush.msk.msrb.mxu3 %vm1650_vm11, %v587_v34 }
 0x1d5   : > { %v578_v55 = vpop.permute.xlu1 %577 }
 0x1d6   : > { %v576_v58 = vpop.permute.xlu0 %575 }
 0x1d7   : > { %v580_v44 = vsel %vm1651_vm15, %v578_v55, %v576_v58  ;;  %v579_v59 = vsel %vm1652_vm13, %v576_v58, %v578_v55 }
 0x1d8   : > { %841 = vmatpush.msk.msrb.mxu2 %vm1358_vm6, %v580_v44  ;;  %850 = vmatpush.msk.msrb.mxu3 %vm1362_vm5, %v579_v59  ;;  %vm1655_vm6 = vcmp.lt.s32.totalorder %v1240_v13, 17 }
 0x1d9   : > { %vm1656_vm5 = vmmov %vm1655_vm6 }
 0x1dd   : > { %v560_v56 = vpop.permute.xlu1 %559 }
 0x1de   : > { %v570_v62 = vpop.permute.xlu0 %569  ;;  %v564_v61 = vsel %vm1655_vm6, %v562_v0, %v560_v56  ;;  %v563_v1 = vsel %vm1656_vm5, %v560_v56, %v562_v0 }
 0x1df   : > { %v572_v57 = vsel %vm1653_vm12, %v570_v62, %v568_v43  ;;  %v571_v63 = vsel %vm1654_vm8, %v568_v43, %v570_v62 }
 0x1e0   : > { %842 = vmatpush.msk.msrb.mxu2 %vm1390_vm7, %v572_v57  ;;  %851 = vmatpush.msk.msrb.mxu3 %vm1394_vm4, %v571_v63  ;;  %vm1658_vm7 = vcmask 588800  }
 0x1e1   : > { %vm1659_vm4 = vmmov %vm1658_vm7 }
 0x1e2   : > { %843 = vmatpush.msk.msrb.mxu2 %vm1408_vm0, %v564_v61  ;;  %852 = vmatpush.msk.msrb.mxu3 %vm1657_vm14, %v563_v1 }
 0x1e3   : > { %844 = vmatmul.msk.f32.vlgmr.msrb.gmra.mxu2 %vm1658_vm7, %v357_v60  ;;  %853 = vmatmul.msk.f32.vlgmr.msrb.gmra.mxu3 %vm1659_vm4, %v357_v60 }
 0x1e6   : > { %v714_v13 = vpop.permute.xlu0 %713 }
 0x266   : > { %v687_v5 = vpop.f32.mrf.mxu2  ;;  %v707_v7 = vpop.f32.mrf.mxu3 }
 0x267   : > { %v688_v8 = vadd.f32 %v687_v5, %v644_v2  ;;  %v708_v9 = vadd.f32 %v707_v7, %v664_v3 }
 0x269   : > { %v716_v10 = vadd.f32 %v714_v13, %v688_v8  ;;  %v717_v11 = vadd.f32 %v714_v13, %v708_v9 }
 0x26b   : > { %718 = vst [vmem:[%s350_s27] sm:$0xff] %v716_v10 }
 0x26c   : > { %719 = vst [vmem:[%s350_s27 + $0x8] sm:$0xff] %v717_v11 }
 0x26d   : > { %975 = shalt.err (!%p972_p4)
}
 0x26e   : > { %863 = dma.vmem_to_hbm [thread:$0]  (%p1125_p11), %s735_s18, 256, %s737_s29, %s721_s13  }
 0x26f PF: > { %s748_s23 = sand.u32 1, %s1002_s30   ;;  %p1660_p7 = scmp.ge.s32.totalorder %s1014_s12, 2 }
 0x270   : > { %s749_s15 = scalar_lea.sflag [#allocation4], %s748_s23 }
 0x271   : > { %p870_p5 = pnand %p1660_p7, %p1129_p12 }
 0x273   : > { %p871_p8 = pneg %p870_p5 }
 0x275   : > { %997 = dma.done.wait (%p871_p8), %s749_s15, 256  }
 0x276   : > { %999 = vsyncadd (%p871_p8), %s749_s15, 4294967040  ;;  %s1661_s12 = sld [smem:[#allocation9_spill]]  ;;  %s1664_s30 = smov %s1006_s10 }
 0x277   : > { %s1662_s28 = sld [smem:[#allocation8_spill]] }
 0x278   : > { %s1663_s11 = sld [smem:[#allocation10_spill]] }
 0x27c   : > { %p22_p10 = scmp.ge.s32.totalorder %s1661_s12, 4  }
 0x27d   : > { %s1665_s10 = smov %s1662_s28 }
 0x27e   :  { %24 = sbr.rel (!%p22_p10) target bundleno = 5 (0x5), region = 101 }
 0x283   :  { %755 = vsyncpa [#allocation3], 1 }
 0x284   :  { %757 = vsyncpa [#allocation3 + $0x1], 1 }
 0x285   :  { %758 = vsyncpa [#allocation4], 1 }
 0x286   :  { %760 = vsyncpa [#allocation4 + $0x1], 1 }

</bundles_post_ra>
